<compile_context>
chip_gen: v6e
topology: v6e:2x2x1
jax: 0.10.0
libtpu: 0.0.40
codegen_flags: <defaults>
</compile_context>

<pallas_src>
import math

import jax
import jax.numpy as jnp
from jax.experimental import pallas as pl
from jax.experimental.pallas import tpu as pltpu


_LANE = 128                 # lane width; safe sublane multiple for all dtypes
_TILE_TARGET = 512          # ~512-wide tiles reach ~85% of HBM roofline
_TINY_BYTES = 64 * 1024     # below this, Pallas overhead dominates -> plain XLA


def _round_up(x, m):
    return (x + m - 1) // m * m


def _tpu_budgets():
    """Returns (per-step block-bytes target, vmem_limit_bytes), per generation."""
    try:
        info = pltpu.get_tpu_info()
        vmem = int(getattr(info, "vmem_capacity_bytes", 128 * 1024 * 1024))
    except Exception:  # query unavailable -> assume the common 128 MiB case
        vmem = 128 * 1024 * 1024
    if vmem >= 96 * 1024 * 1024:
        # v5e / v6e: 128 MiB VMEM -> bigger per-step blocks amortize step overhead.
        return 4 * 1024 * 1024, 64 * 1024 * 1024
    # v7x: 64 MiB VMEM -> keep 2 in + 2 out double-buffers well inside 32 MiB.
    return 2 * 1024 * 1024, 32 * 1024 * 1024


def _pick_tile(dim):
    """Tile size for one trailing dim: multiple of 128, capped at 512.
    No divisibility requirement -- edge blocks are partial (masked)."""
    return min(_TILE_TARGET, _round_up(dim, _LANE))


def _transpose_kernel(x_ref, o_ref):
    # x_ref block: (bb, tm, tn) -> o_ref block: (bb, tn, tm).
    # XLU transpose of the two minor dims on the resident VMEM tile.
    # TODO(synk): on v7x, if the vector-extended (XLU) slot binds instead of
    # HBM, do the intra-tile transpose on the idle MXU for bf16/int8 inputs.
    o_ref[...] = jnp.swapaxes(x_ref[...], 1, 2)


def _pallas_transpose_3d(x):
    B, M, N = x.shape
    itemsize = jnp.dtype(x.dtype).itemsize
    step_bytes_target, vmem_limit = _tpu_budgets()

    tm = _pick_tile(M)
    tn = _pick_tile(N)

    # Pack several batch elements per grid step so each step moves enough
    # bytes; the batch axis is cdiv'd so bb need not divide B.
    tile_bytes = tm * tn * itemsize
    bb = max(1, min(B, step_bytes_target // tile_bytes))

    # i (over M) innermost: consecutive steps fill contiguous column panels of
    # the same output row panel -> slightly better HBM write-back.
    grid = (pl.cdiv(B, bb), pl.cdiv(N, tn), pl.cdiv(M, tm))

    return pl.pallas_call(
        _transpose_kernel,
        out_shape=jax.ShapeDtypeStruct((B, N, M), x.dtype),
        grid_spec=pltpu.PrefetchScalarGridSpec(
            num_scalar_prefetch=0,
            grid=grid,
            in_specs=[pl.BlockSpec((bb, tm, tn), lambda b, j, i: (b, i, j))],
            out_specs=pl.BlockSpec((bb, tn, tm), lambda b, j, i: (b, j, i)),
        ),
        compiler_params=pltpu.CompilerParams(
            dimension_semantics=("parallel", "parallel", "parallel"),
            vmem_limit_bytes=vmem_limit,
        ),
        cost_estimate=pl.CostEstimate(
            flops=0,
            transcendentals=0,
            bytes_accessed=2 * B * M * N * itemsize,
        ),
    )(x)


def rearrange(x, dim1=1, dim2=2):
    """Pallas equivalent of torch.Tensor.transpose(dim1, dim2).

    The Pallas path handles the module's default case (swap of the trailing
    two axes, any number of leading dims); other axis pairs fall back to XLA.
    """
    d1 = dim1 % x.ndim
    d2 = dim2 % x.ndim
    if d1 == d2:
        return x

    # TODO(synk): when this Rearrange only feeds a matmul, fold the axis swap
    # into the consumer's dot_general / pl.dot trans flags instead of
    # materializing the transpose (removes the whole 2x-HBM-pass cost).

    lo, hi = sorted((d1, d2))
    if x.ndim < 2 or (lo, hi) != (x.ndim - 2, x.ndim - 1):
        # TODO(synk): swaps involving non-trailing axes need a different tiling
        # (strided leading-dim DMA); fall back to XLA relayout for those.
        return jnp.swapaxes(x, d1, d2)

    # Tiny tensors: per-grid-step overhead dwarfs the HBM traffic; let XLA
    # do the relayout directly.
    if x.size * jnp.dtype(x.dtype).itemsize < _TINY_BYTES:
        return jnp.swapaxes(x, d1, d2)

    lead = x.shape[:-2]
    M, N = x.shape[-2], x.shape[-1]
    B = int(math.prod(lead)) if lead else 1
    out = _pallas_transpose_3d(x.reshape(B, M, N))
    return out.reshape(*lead, N, M)


if __name__ == "__main__":
    key = jax.random.PRNGKey(0)
    k1, k2, k3 = jax.random.split(key, 3)

    # ViT-style token tensor (batch, 196 patches + cls, hidden) -> Pallas path
    # with partial (masked) edge blocks and no wrapper pad/slice.
    x1 = jax.random.normal(k1, (2, 197, 192), dtype=jnp.float32)
    y1 = jax.block_until_ready(rearrange(x1))
    assert y1.shape == (2, 192, 197) and y1.dtype == x1.dtype
    assert jnp.array_equal(y1, jnp.swapaxes(x1, 1, 2))

    # Aligned bf16 case -> Pallas path, full blocks, batched grid step.
    x2 = jax.random.normal(k2, (2, 256, 384), dtype=jnp.bfloat16)
    y2 = jax.block_until_ready(rearrange(x2))
    assert y2.shape == (2, 384, 256) and y2.dtype == x2.dtype
    assert jnp.array_equal(y2, jnp.swapaxes(x2, 1, 2))

    # Tiny tensor -> wrapper falls back to plain XLA swapaxes.
    x3 = jax.random.normal(k3, (2, 16, 32), dtype=jnp.float32)
    y3 = jax.block_until_ready(rearrange(x3, dim1=1, dim2=2))
    assert y3.shape == (2, 32, 16)
    assert jnp.array_equal(y3, jnp.swapaxes(x3, 1, 2))

    print("KERNEL_OK")
</pallas_src>

<mosaic_0001>
module attributes {stable_mosaic.version = 11 : i64} {
  func.func @_transpose_kernel(%arg0: i32, %arg1: i32, %arg2: i32, %arg3: memref<2x256x256xf32, #tpu.memory_space<vmem>>, %arg4: memref<2x256x256xf32, #tpu.memory_space<vmem>>) attributes {dimension_semantics = [#tpu.dimension_semantics<parallel>, #tpu.dimension_semantics<parallel>, #tpu.dimension_semantics<parallel>], iteration_bounds = array<i64: 1, 1, 1>, scalar_prefetch = 0 : i64, scratch_operands = 0 : i64, tpu.core_type = #tpu.core_type<tc>, window_params = [{transform_indices = @transform_0, window_bounds = array<i64: 2, 256, 256>}, {transform_indices = @transform_1, window_bounds = array<i64: 2, 256, 256>}]} {
    %c0 = arith.constant 0 : index
    %c0_0 = arith.constant 0 : index
    %c0_1 = arith.constant 0 : index
    %0 = vector.load %arg3[%c0, %c0_0, %c0_1] : memref<2x256x256xf32, #tpu.memory_space<vmem>>, vector<2x256x256xf32>
    %1 = tpu.transpose %0, [0, 2, 1] : vector<2x256x256xf32> -> vector<2x256x256xf32>
    %c0_2 = arith.constant 0 : index
    %c0_3 = arith.constant 0 : index
    %c0_4 = arith.constant 0 : index
    %2 = vector.load %arg4[%c0_2, %c0_3, %c0_4] : memref<2x256x256xf32, #tpu.memory_space<vmem>>, vector<2x256x256xf32>
    tpu.vector_store %arg4[%c0_2, %c0_3, %c0_4], %1 {strides = array<i32>} : memref<2x256x256xf32, #tpu.memory_space<vmem>>, vector<2x256x256xf32>,
    return
  }
  func.func @transform_0(%arg0: i32, %arg1: i32, %arg2: i32) -> (i32, i32, i32) {
    %c0_i32 = arith.constant 0 : i32
    return %arg0, %arg2, %arg1 : i32, i32, i32
  }
  func.func @transform_1(%arg0: i32, %arg1: i32, %arg2: i32) -> (i32, i32, i32) {
    %c0_i32 = arith.constant 0 : i32
    return %arg0, %arg1, %arg2 : i32, i32, i32
  }
}

</mosaic_0001>

<bundles_post_ra>
// kernel: tpu_custom_call.1
= control target key start
LH: loop header
LB: loop body
LE: loop exit
PB: predicated region body
PF: predicated region fallthrough
CT: control target
= control target key end

     0   :  { %s1369_s0 = inlined_call_operand.vmem [shape: f32[2,197,192], index: 0, kind: input, shape index: {}]   ;;  %s1370_s1 = inlined_call_operand.hbm [shape: f32[2,192,197], index: 1, kind: output, shape index: {}]  }
   0x1   :  { %v23_v0 = vld [vmem:[%s1369_s0 + $0x8] sm:$0xff]  ;;  %v21_v1 = vld [vmem:[%s1369_s0] sm:$0xff]  ;;  %v27_v2 = vld [vmem:[%s1369_s0 + $0x18] sm:$0xff] }
   0x2   :  { %386 = vxpose.xlu1.b32.start [1/16] %v23_v0, 128  ;;  %354 = vxpose.xlu0.b32.start [1/16] %v21_v1, 128  ;;  %v25_v3 = vld [vmem:[%s1369_s0 + $0x10] sm:$0xff]  ;;  %v31_v4 = vld [vmem:[%s1369_s0 + $0x28] sm:$0xff]  ;;  %v29_v5 = vld [vmem:[%s1369_s0 + $0x20] sm:$0xff] }
   0x3   :  { %v35_v6 = vld [vmem:[%s1369_s0 + $0x38] sm:$0xff]  ;;  %v33_v7 = vld [vmem:[%s1369_s0 + $0x30] sm:$0xff]  ;;  %v39_v8 = vld [vmem:[%s1369_s0 + $0x48] sm:$0xff] }
   0x4   :  { %v37_v9 = vld [vmem:[%s1369_s0 + $0x40] sm:$0xff]  ;;  %v43_v10 = vld [vmem:[%s1369_s0 + $0x58] sm:$0xff]  ;;  %v41_v11 = vld [vmem:[%s1369_s0 + $0x50] sm:$0xff] }
   0x5   :  { %v47_v12 = vld [vmem:[%s1369_s0 + $0x68] sm:$0xff]  ;;  %v45_v13 = vld [vmem:[%s1369_s0 + $0x60] sm:$0xff]  ;;  %v856_v14 = vld [vmem:[%s1369_s0 + $0x78] sm:$0xff] }
   0x6   :  { %387 = vxpose.xlu1.b32.cont [2/16] %v27_v2, 128  ;;  %355 = vxpose.xlu0.b32.cont [2/16] %v25_v3, 128  ;;  %v49_v15 = vld [vmem:[%s1369_s0 + $0x70] sm:$0xff]  ;;  %v864_v16 = vld [vmem:[%s1369_s0 + $0x88] sm:$0xff]  ;;  %v869_v17 = vld [vmem:[%s1369_s0 + $0x80] sm:$0xff] }
   0x7   :  { %v874_v18 = vld [vmem:[%s1369_s0 + $0x98] sm:$0xff]  ;;  %v879_v19 = vld [vmem:[%s1369_s0 + $0x90] sm:$0xff]  ;;  %v884_v20 = vld [vmem:[%s1369_s0 + $0xa8] sm:$0xff] }
   0x8   :  { %v889_v21 = vld [vmem:[%s1369_s0 + $0xa0] sm:$0xff]  ;;  %v894_v22 = vld [vmem:[%s1369_s0 + $0xb8] sm:$0xff]  ;;  %v899_v23 = vld [vmem:[%s1369_s0 + $0xb0] sm:$0xff] }
   0x9   :  { %v904_v24 = vld [vmem:[%s1369_s0 + $0xc8] sm:$0xff]  ;;  %v909_v25 = vld [vmem:[%s1369_s0 + $0xc0] sm:$0xff]  ;;  %v914_v26 = vld [vmem:[%s1369_s0 + $0xd8] sm:$0xff] }
   0xa   :  { %388 = vxpose.xlu1.b32.cont [3/16] %v31_v4, 128  ;;  %356 = vxpose.xlu0.b32.cont [3/16] %v29_v5, 128  ;;  %v919_v27 = vld [vmem:[%s1369_s0 + $0xd0] sm:$0xff]  ;;  %v924_v28 = vld [vmem:[%s1369_s0 + $0xe8] sm:$0xff]  ;;  %v929_v29 = vld [vmem:[%s1369_s0 + $0xe0] sm:$0xff] }
   0xb   :  { %v934_v30 = vld [vmem:[%s1369_s0 + $0xf8] sm:$0xff]  ;;  %v939_v31 = vld [vmem:[%s1369_s0 + $0xf0] sm:$0xff]  ;;  %v944_v32 = vld [vmem:[%s1369_s0 + $0x108] sm:$0xff] }
   0xc   :  { %v949_v33 = vld [vmem:[%s1369_s0 + $0x100] sm:$0xff]  ;;  %v954_v34 = vld [vmem:[%s1369_s0 + $0x118] sm:$0xff]  ;;  %v959_v35 = vld [vmem:[%s1369_s0 + $0x110] sm:$0xff] }
   0xd   :  { %v964_v36 = vld [vmem:[%s1369_s0 + $0x128] sm:$0xff]  ;;  %v969_v37 = vld [vmem:[%s1369_s0 + $0x120] sm:$0xff]  ;;  %v974_v38 = vld [vmem:[%s1369_s0 + $0x138] sm:$0xff] }
   0xe   :  { %389 = vxpose.xlu1.b32.cont [4/16] %v35_v6, 128  ;;  %357 = vxpose.xlu0.b32.cont [4/16] %v33_v7, 128  ;;  %v979_v39 = vld [vmem:[%s1369_s0 + $0x130] sm:$0xff]  ;;  %v984_v40 = vld [vmem:[%s1369_s0 + $0x148] sm:$0xff]  ;;  %v989_v41 = vld [vmem:[%s1369_s0 + $0x140] sm:$0xff] }
   0xf   :  { %v994_v42 = vld [vmem:[%s1369_s0 + $0x158] sm:$0xff]  ;;  %v999_v43 = vld [vmem:[%s1369_s0 + $0x150] sm:$0xff]  ;;  %v1004_v44 = vld [vmem:[%s1369_s0 + $0x168] sm:$0xff] }
  0x10   :  { %v1009_v45 = vld [vmem:[%s1369_s0 + $0x160] sm:$0xff]  ;;  %v1014_v46 = vld [vmem:[%s1369_s0 + $0x178] sm:$0xff]  ;;  %v1019_v47 = vld [vmem:[%s1369_s0 + $0x170] sm:$0xff] }
  0x11   :  { %v1024_v48 = vld [vmem:[%s1369_s0 + $0x188] sm:$0xff]  ;;  %v1029_v49 = vld [vmem:[%s1369_s0 + $0x180] sm:$0xff]  ;;  %v1034_v50 = vld [vmem:[%s1369_s0 + $0x198] sm:$0xff] }
  0x12   :  { %390 = vxpose.xlu1.b32.cont [5/16] %v39_v8, 128  ;;  %358 = vxpose.xlu0.b32.cont [5/16] %v37_v9, 128  ;;  %v1039_v51 = vld [vmem:[%s1369_s0 + $0x190] sm:$0xff]  ;;  %v1044_v52 = vld [vmem:[%s1369_s0 + $0x1a8] sm:$0xff]  ;;  %v1049_v53 = vld [vmem:[%s1369_s0 + $0x1a0] sm:$0xff] }
  0x13   :  { %v1054_v54 = vld [vmem:[%s1369_s0 + $0x1b8] sm:$0xff]  ;;  %v1059_v55 = vld [vmem:[%s1369_s0 + $0x1b0] sm:$0xff]  ;;  %v1064_v56 = vld [vmem:[%s1369_s0 + $0x1c8] sm:$0xff] }
  0x14   :  { %v1069_v57 = vld [vmem:[%s1369_s0 + $0x1c0] sm:$0xff]  ;;  %v1074_v58 = vld [vmem:[%s1369_s0 + $0x1d8] sm:$0xff]  ;;  %v1079_v59 = vld [vmem:[%s1369_s0 + $0x1d0] sm:$0xff] }
  0x15   :  { %v1084_v60 = vld [vmem:[%s1369_s0 + $0x1e8] sm:$0xff]  ;;  %v1089_v61 = vld [vmem:[%s1369_s0 + $0x1e0] sm:$0xff]  ;;  %v1094_v62 = vld [vmem:[%s1369_s0 + $0x1f8] sm:$0xff] }
  0x16   :  { %391 = vxpose.xlu1.b32.cont [6/16] %v43_v10, 128  ;;  %359 = vxpose.xlu0.b32.cont [6/16] %v41_v11, 128  ;;  %v1099_v63 = vld [vmem:[%s1369_s0 + $0x1f0] sm:$0xff]  ;;  %v1104_v0 = vld [vmem:[%s1369_s0 + $0x208] sm:$0xff] }
  0x1a   :  { %392 = vxpose.xlu1.b32.cont [7/16] %v47_v12, 128  ;;  %360 = vxpose.xlu0.b32.cont [7/16] %v45_v13, 128 }
  0x1b   :  { %6 = vsyncpa [#allocation4], 0  ;;  %v1109_v1 = vld [vmem:[%s1369_s0 + $0x200] sm:$0xff]  ;;  %v1115_v2 = vld [vmem:[%s1369_s0 + $0x218] sm:$0xff] }
  0x1c   :  { %v1120_v3 = vld [vmem:[%s1369_s0 + $0x210] sm:$0xff]  ;;  %v1127_v4 = vld [vmem:[%s1369_s0 + $0x228] sm:$0xff]  ;;  %v1132_v5 = vld [vmem:[%s1369_s0 + $0x220] sm:$0xff] }
  0x1d   :  { %v1139_v6 = vld [vmem:[%s1369_s0 + $0x238] sm:$0xff]  ;;  %v1144_v7 = vld [vmem:[%s1369_s0 + $0x230] sm:$0xff]  ;;  %v1151_v8 = vld [vmem:[%s1369_s0 + $0x248] sm:$0xff] }
  0x1e   :  { %393 = vxpose.xlu1.b32.cont [8/16] %v856_v14, 128  ;;  %361 = vxpose.xlu0.b32.cont [8/16] %v49_v15, 128  ;;  %v1156_v9 = vld [vmem:[%s1369_s0 + $0x240] sm:$0xff]  ;;  %v1163_v10 = vld [vmem:[%s1369_s0 + $0x258] sm:$0xff]  ;;  %v1168_v11 = vld [vmem:[%s1369_s0 + $0x250] sm:$0xff] }
  0x1f   :  { %v1175_v12 = vld [vmem:[%s1369_s0 + $0x268] sm:$0xff]  ;;  %v1180_v13 = vld [vmem:[%s1369_s0 + $0x260] sm:$0xff]  ;;  %v1187_v14 = vld [vmem:[%s1369_s0 + $0x278] sm:$0xff] }
  0x20   :  { %v1192_v15 = vld [vmem:[%s1369_s0 + $0x270] sm:$0xff] }
  0x22   :  { %394 = vxpose.xlu1.b32.cont [9/16] %v864_v16, 128  ;;  %362 = vxpose.xlu0.b32.cont [9/16] %v869_v17, 128  ;;  %v1199_v16 = vld [vmem:[%s1369_s0 + $0x288] sm:$0xff]  ;;  %v1204_v17 = vld [vmem:[%s1369_s0 + $0x280] sm:$0xff] }
  0x26   :  { %395 = vxpose.xlu1.b32.cont [10/16] %v874_v18, 128  ;;  %363 = vxpose.xlu0.b32.cont [10/16] %v879_v19, 128  ;;  %v1211_v18 = vld [vmem:[%s1369_s0 + $0x298] sm:$0xff]  ;;  %v1216_v19 = vld [vmem:[%s1369_s0 + $0x290] sm:$0xff] }
  0x2a   :  { %396 = vxpose.xlu1.b32.cont [11/16] %v884_v20, 128  ;;  %364 = vxpose.xlu0.b32.cont [11/16] %v889_v21, 128  ;;  %v1223_v20 = vld [vmem:[%s1369_s0 + $0x2a8] sm:$0xff]  ;;  %v1228_v21 = vld [vmem:[%s1369_s0 + $0x2a0] sm:$0xff] }
  0x2e   :  { %397 = vxpose.xlu1.b32.cont [12/16] %v894_v22, 128  ;;  %365 = vxpose.xlu0.b32.cont [12/16] %v899_v23, 128  ;;  %v1235_v22 = vld [vmem:[%s1369_s0 + $0x2b8] sm:$0xff]  ;;  %v1240_v23 = vld [vmem:[%s1369_s0 + $0x2b0] sm:$0xff] }
  0x32   :  { %398 = vxpose.xlu1.b32.cont [13/16] %v904_v24, 128  ;;  %366 = vxpose.xlu0.b32.cont [13/16] %v909_v25, 128  ;;  %v1247_v24 = vld [vmem:[%s1369_s0 + $0x2c8] sm:$0xff]  ;;  %v1252_v25 = vld [vmem:[%s1369_s0 + $0x2c0] sm:$0xff] }
  0x36   :  { %399 = vxpose.xlu1.b32.cont [14/16] %v914_v26, 128  ;;  %367 = vxpose.xlu0.b32.cont [14/16] %v919_v27, 128  ;;  %v1259_v26 = vld [vmem:[%s1369_s0 + $0x2d8] sm:$0xff]  ;;  %v1264_v27 = vld [vmem:[%s1369_s0 + $0x2d0] sm:$0xff] }
  0x3a   :  { %400 = vxpose.xlu1.b32.cont [15/16] %v924_v28, 128  ;;  %368 = vxpose.xlu0.b32.cont [15/16] %v929_v29, 128  ;;  %v1271_v28 = vld [vmem:[%s1369_s0 + $0x2e8] sm:$0xff]  ;;  %v1276_v29 = vld [vmem:[%s1369_s0 + $0x2e0] sm:$0xff] }
  0x3e   :  { %401 = vxpose.xlu1.b32.end [16/16] %v934_v30, 128  ;;  %369 = vxpose.xlu0.b32.end [16/16] %v939_v31, 128  ;;  %v1283_v30 = vld [vmem:[%s1369_s0 + $0x2f8] sm:$0xff]  ;;  %v1288_v31 = vld [vmem:[%s1369_s0 + $0x2f0] sm:$0xff] }
  0x42   :  { %450 = vxpose.xlu1.b32.start [1/16] %v944_v32, 128  ;;  %418 = vxpose.xlu0.b32.start [1/16] %v949_v33, 128  ;;  %v1295_v32 = vld [vmem:[%s1369_s0 + $0x308] sm:$0xff]  ;;  %v1300_v33 = vld [vmem:[%s1369_s0 + $0x300] sm:$0xff] }
  0x46   :  { %451 = vxpose.xlu1.b32.cont [2/16] %v954_v34, 128  ;;  %419 = vxpose.xlu0.b32.cont [2/16] %v959_v35, 128  ;;  %v1307_v34 = vld [vmem:[%s1369_s0 + $0x318] sm:$0xff]  ;;  %v1312_v35 = vld [vmem:[%s1369_s0 + $0x310] sm:$0xff] }
  0x4a   :  { %452 = vxpose.xlu1.b32.cont [3/16] %v964_v36, 128  ;;  %420 = vxpose.xlu0.b32.cont [3/16] %v969_v37, 128  ;;  %v277_v36 = vld [vmem:[#allocation2 + $0xa8] sm:$0xff]  ;;  %v276_v37 = vld [vmem:[#allocation2 + $0x210] sm:$0xff] }
  0x4e   :  { %453 = vxpose.xlu1.b32.cont [4/16] %v974_v38, 128  ;;  %421 = vxpose.xlu0.b32.cont [4/16] %v979_v39, 128  ;;  %v279_v38 = vld [vmem:[#allocation2 + $0x348] sm:$0xff] }
  0x4f   :  { %v278_v39 = vld [vmem:[#allocation2 + $0x2c8] sm:$0xff] }
  0x52   :  { %454 = vxpose.xlu1.b32.cont [5/16] %v984_v40, 128  ;;  %422 = vxpose.xlu0.b32.cont [5/16] %v989_v41, 128  ;;  %v281_v40 = vld [vmem:[#allocation2 + $0x180] sm:$0xff]  ;;  %v280_v41 = vld [vmem:[#allocation2 + $0xf0] sm:$0xff] }
  0x56   :  { %455 = vxpose.xlu1.b32.cont [6/16] %v994_v42, 128  ;;  %423 = vxpose.xlu0.b32.cont [6/16] %v999_v43, 128  ;;  %v283_v42 = vld [vmem:[#allocation2 + $0x3d0] sm:$0xff] }
  0x57   :  { %v282_v43 = vld [vmem:[#allocation2 + $0x170] sm:$0xff] }
  0x5a   :  { %456 = vxpose.xlu1.b32.cont [7/16] %v1004_v44, 128  ;;  %424 = vxpose.xlu0.b32.cont [7/16] %v1009_v45, 128  ;;  %v285_v44 = vld [vmem:[#allocation2 + $0x1e8] sm:$0xff]  ;;  %v284_v45 = vld [vmem:[#allocation2 + $0x2c0] sm:$0xff] }
  0x5e   :  { %457 = vxpose.xlu1.b32.cont [8/16] %v1014_v46, 128  ;;  %425 = vxpose.xlu0.b32.cont [8/16] %v1019_v47, 128  ;;  %v287_v46 = vld [vmem:[#allocation2 + $0x38] sm:$0xff] }
  0x5f   :  { %v286_v47 = vld [vmem:[#allocation2 + $0xb8] sm:$0xff] }
  0x62   :  { %458 = vxpose.xlu1.b32.cont [9/16] %v1024_v48, 128  ;;  %426 = vxpose.xlu0.b32.cont [9/16] %v1029_v49, 128  ;;  %v289_v48 = vld [vmem:[#allocation2 + $0x378] sm:$0xff] }
  0x63   :  { %v288_v49 = vld [vmem:[#allocation2 + $0x78] sm:$0xff] }
  0x66   :  { %459 = vxpose.xlu1.b32.cont [10/16] %v277_v36, 128  ;;  %427 = vxpose.xlu0.b32.cont [10/16] %v276_v37, 128 }
  0x6a   :  { %460 = vxpose.xlu1.b32.cont [11/16] %v279_v38, 128  ;;  %428 = vxpose.xlu0.b32.cont [11/16] %v278_v39, 128 }
  0x6e   :  { %461 = vxpose.xlu1.b32.cont [12/16] %v281_v40, 128  ;;  %429 = vxpose.xlu0.b32.cont [12/16] %v280_v41, 128 }
  0x72   :  { %462 = vxpose.xlu1.b32.cont [13/16] %v283_v42, 128  ;;  %430 = vxpose.xlu0.b32.cont [13/16] %v282_v43, 128  ;;  %v340_v43 = vld [vmem:[#allocation2 + $0x1e0] sm:$0xff] }
  0x76   :  { %463 = vxpose.xlu1.b32.cont [14/16] %v285_v44, 128  ;;  %431 = vxpose.xlu0.b32.cont [14/16] %v284_v45, 128  ;;  %v342_v45 = vld [vmem:[#allocation2 + $0x2e8] sm:$0xff] }
  0x7a   :  { %464 = vxpose.xlu1.b32.cont [15/16] %v287_v46, 128  ;;  %432 = vxpose.xlu0.b32.cont [15/16] %v286_v47, 128  ;;  %v344_v47 = vld [vmem:[#allocation2 + $0x298] sm:$0xff] }
  0x7e   :  { %465 = vxpose.xlu1.b32.end [16/16] %v289_v48, 128  ;;  %v402_v36 = vpop.trf.xlu1  ;;  %433 = vxpose.xlu0.b32.end [16/16] %v288_v49, 128  ;;  %v370_v37 = vpop.trf.xlu0 }
  0x7f   :  { %642 = vst [vmem:[#allocation3 + $0x100] sm:$0xff] %v402_v36  ;;  %610 = vst [vmem:[#allocation3] sm:$0xff] %v370_v37  ;;  %v347_v36 = vld [vmem:[#allocation2 + $0xf8] sm:$0xff]  ;;  %v346_v37 = vld [vmem:[#allocation2 + $0x148] sm:$0xff] }
  0x82   :  { %514 = vxpose.xlu1.b32.start [1/16] %v1034_v50, 128  ;;  %v403_v38 = vpop.trf.xlu1  ;;  %482 = vxpose.xlu0.b32.start [1/16] %v1039_v51, 128  ;;  %v371_v39 = vpop.trf.xlu0 }
  0x83   :  { %644 = vst [vmem:[#allocation3 + $0x110] sm:$0xff] %v403_v38  ;;  %612 = vst [vmem:[#allocation3 + $0x10] sm:$0xff] %v371_v39 }
  0x86   :  { %515 = vxpose.xlu1.b32.cont [2/16] %v1044_v52, 128  ;;  %v404_v40 = vpop.trf.xlu1  ;;  %483 = vxpose.xlu0.b32.cont [2/16] %v1049_v53, 128  ;;  %v372_v41 = vpop.trf.xlu0 }
  0x87   :  { %646 = vst [vmem:[#allocation3 + $0x120] sm:$0xff] %v404_v40  ;;  %614 = vst [vmem:[#allocation3 + $0x20] sm:$0xff] %v372_v41  ;;  %v349_v40 = vld [vmem:[#allocation2] sm:$0xff]  ;;  %v348_v41 = vld [vmem:[#allocation2 + $0x68] sm:$0xff] }
  0x8a   :  { %516 = vxpose.xlu1.b32.cont [3/16] %v1054_v54, 128  ;;  %v405_v42 = vpop.trf.xlu1  ;;  %484 = vxpose.xlu0.b32.cont [3/16] %v1059_v55, 128  ;;  %v373_v50 = vpop.trf.xlu0 }
  0x8b   :  { %648 = vst [vmem:[#allocation3 + $0x130] sm:$0xff] %v405_v42  ;;  %616 = vst [vmem:[#allocation3 + $0x30] sm:$0xff] %v373_v50 }
  0x8e   :  { %517 = vxpose.xlu1.b32.cont [4/16] %v1064_v56, 128  ;;  %v406_v51 = vpop.trf.xlu1  ;;  %485 = vxpose.xlu0.b32.cont [4/16] %v1069_v57, 128  ;;  %v374_v52 = vpop.trf.xlu0 }
  0x8f   :  { %650 = vst [vmem:[#allocation3 + $0x140] sm:$0xff] %v406_v51  ;;  %618 = vst [vmem:[#allocation3 + $0x40] sm:$0xff] %v374_v52  ;;  %v351_v51 = vld [vmem:[#allocation2 + $0x2e0] sm:$0xff]  ;;  %v350_v52 = vld [vmem:[#allocation2 + $0x308] sm:$0xff] }
  0x92   :  { %518 = vxpose.xlu1.b32.cont [5/16] %v1074_v58, 128  ;;  %v407_v53 = vpop.trf.xlu1  ;;  %486 = vxpose.xlu0.b32.cont [5/16] %v1079_v59, 128  ;;  %v375_v54 = vpop.trf.xlu0 }
  0x93   :  { %652 = vst [vmem:[#allocation3 + $0x150] sm:$0xff] %v407_v53  ;;  %620 = vst [vmem:[#allocation3 + $0x50] sm:$0xff] %v375_v54 }
  0x96   :  { %519 = vxpose.xlu1.b32.cont [6/16] %v1084_v60, 128  ;;  %v408_v55 = vpop.trf.xlu1  ;;  %487 = vxpose.xlu0.b32.cont [6/16] %v1089_v61, 128  ;;  %v376_v56 = vpop.trf.xlu0 }
  0x97   :  { %654 = vst [vmem:[#allocation3 + $0x160] sm:$0xff] %v408_v55  ;;  %622 = vst [vmem:[#allocation3 + $0x60] sm:$0xff] %v376_v56  ;;  %v353_v55 = vld [vmem:[#allocation2 + $0x200] sm:$0xff] }
  0x98   :  { %v352_v56 = vld [vmem:[#allocation2 + $0x380] sm:$0xff] }
  0x9a   :  { %520 = vxpose.xlu1.b32.cont [7/16] %v1094_v62, 128  ;;  %v409_v57 = vpop.trf.xlu1  ;;  %488 = vxpose.xlu0.b32.cont [7/16] %v1099_v63, 128  ;;  %v377_v58 = vpop.trf.xlu0 }
  0x9b   :  { %656 = vst [vmem:[#allocation3 + $0x170] sm:$0xff] %v409_v57  ;;  %624 = vst [vmem:[#allocation3 + $0x70] sm:$0xff] %v377_v58 }
  0x9e   :  { %521 = vxpose.xlu1.b32.cont [8/16] %v1104_v0, 128  ;;  %v410_v59 = vpop.trf.xlu1  ;;  %489 = vxpose.xlu0.b32.cont [8/16] %v1109_v1, 128  ;;  %v378_v60 = vpop.trf.xlu0 }
  0x9f   :  { %658 = vst [vmem:[#allocation3 + $0x180] sm:$0xff] %v410_v59  ;;  %626 = vst [vmem:[#allocation3 + $0x80] sm:$0xff] %v378_v60 }
  0xa2   :  { %522 = vxpose.xlu1.b32.cont [9/16] %v1115_v2, 128  ;;  %v411_v61 = vpop.trf.xlu1  ;;  %490 = vxpose.xlu0.b32.cont [9/16] %v1120_v3, 128  ;;  %v379_v62 = vpop.trf.xlu0 }
  0xa3   :  { %660 = vst [vmem:[#allocation3 + $0x190] sm:$0xff] %v411_v61  ;;  %628 = vst [vmem:[#allocation3 + $0x90] sm:$0xff] %v379_v62 }
  0xa6   :  { %523 = vxpose.xlu1.b32.cont [10/16] %v1127_v4, 128  ;;  %v412_v63 = vpop.trf.xlu1  ;;  %491 = vxpose.xlu0.b32.cont [10/16] %v1132_v5, 128  ;;  %v380_v0 = vpop.trf.xlu0 }
  0xa7   :  { %662 = vst [vmem:[#allocation3 + $0x1a0] sm:$0xff] %v412_v63  ;;  %630 = vst [vmem:[#allocation3 + $0xa0] sm:$0xff] %v380_v0 }
  0xaa   :  { %524 = vxpose.xlu1.b32.cont [11/16] %v1139_v6, 128  ;;  %v413_v1 = vpop.trf.xlu1  ;;  %492 = vxpose.xlu0.b32.cont [11/16] %v1144_v7, 128  ;;  %v381_v2 = vpop.trf.xlu0 }
  0xab   :  { %664 = vst [vmem:[#allocation3 + $0x1b0] sm:$0xff] %v413_v1  ;;  %632 = vst [vmem:[#allocation3 + $0xb0] sm:$0xff] %v381_v2 }
  0xae   :  { %525 = vxpose.xlu1.b32.cont [12/16] %v1151_v8, 128  ;;  %v414_v3 = vpop.trf.xlu1  ;;  %493 = vxpose.xlu0.b32.cont [12/16] %v1156_v9, 128  ;;  %v382_v4 = vpop.trf.xlu0 }
  0xaf   :  { %666 = vst [vmem:[#allocation3 + $0x1c0] sm:$0xff] %v414_v3  ;;  %634 = vst [vmem:[#allocation3 + $0xc0] sm:$0xff] %v382_v4 }
  0xb2   :  { %526 = vxpose.xlu1.b32.cont [13/16] %v1163_v10, 128  ;;  %v415_v5 = vpop.trf.xlu1  ;;  %494 = vxpose.xlu0.b32.cont [13/16] %v1168_v11, 128  ;;  %v383_v6 = vpop.trf.xlu0 }
  0xb3   :  { %668 = vst [vmem:[#allocation3 + $0x1d0] sm:$0xff] %v415_v5  ;;  %636 = vst [vmem:[#allocation3 + $0xd0] sm:$0xff] %v383_v6 }
  0xb6   :  { %527 = vxpose.xlu1.b32.cont [14/16] %v1175_v12, 128  ;;  %v416_v7 = vpop.trf.xlu1  ;;  %495 = vxpose.xlu0.b32.cont [14/16] %v1180_v13, 128  ;;  %v384_v8 = vpop.trf.xlu0 }
  0xb7   :  { %670 = vst [vmem:[#allocation3 + $0x1e0] sm:$0xff] %v416_v7  ;;  %638 = vst [vmem:[#allocation3 + $0xe0] sm:$0xff] %v384_v8 }
  0xba   :  { %528 = vxpose.xlu1.b32.cont [15/16] %v1187_v14, 128  ;;  %v417_v9 = vpop.trf.xlu1  ;;  %496 = vxpose.xlu0.b32.cont [15/16] %v1192_v15, 128  ;;  %v385_v10 = vpop.trf.xlu0 }
  0xbb   :  { %672 = vst [vmem:[#allocation3 + $0x1f0] sm:$0xff] %v417_v9  ;;  %640 = vst [vmem:[#allocation3 + $0xf0] sm:$0xff] %v385_v10 }
  0xbe   :  { %529 = vxpose.xlu1.b32.end [16/16] %v1199_v16, 128  ;;  %v466_v11 = vpop.trf.xlu1  ;;  %497 = vxpose.xlu0.b32.end [16/16] %v1204_v17, 128  ;;  %v434_v12 = vpop.trf.xlu0 }
  0xbf   :  { %643 = vst [vmem:[#allocation3 + $0x108] sm:$0xff] %v466_v11  ;;  %611 = vst [vmem:[#allocation3 + $0x8] sm:$0xff] %v434_v12 }
  0xc2   :  { %578 = vxpose.xlu1.b32.start [1/16] %v1211_v18, 128  ;;  %v467_v13 = vpop.trf.xlu1  ;;  %546 = vxpose.xlu0.b32.start [1/16] %v1216_v19, 128  ;;  %v435_v14 = vpop.trf.xlu0 }
  0xc3   :  { %645 = vst [vmem:[#allocation3 + $0x118] sm:$0xff] %v467_v13  ;;  %613 = vst [vmem:[#allocation3 + $0x18] sm:$0xff] %v435_v14 }
  0xc6   :  { %579 = vxpose.xlu1.b32.cont [2/16] %v1223_v20, 128  ;;  %v468_v15 = vpop.trf.xlu1  ;;  %547 = vxpose.xlu0.b32.cont [2/16] %v1228_v21, 128  ;;  %v436_v16 = vpop.trf.xlu0 }
  0xc7   :  { %647 = vst [vmem:[#allocation3 + $0x128] sm:$0xff] %v468_v15  ;;  %615 = vst [vmem:[#allocation3 + $0x28] sm:$0xff] %v436_v16 }
  0xca   :  { %580 = vxpose.xlu1.b32.cont [3/16] %v1235_v22, 128  ;;  %v469_v17 = vpop.trf.xlu1  ;;  %548 = vxpose.xlu0.b32.cont [3/16] %v1240_v23, 128  ;;  %v437_v18 = vpop.trf.xlu0 }
  0xcb   :  { %649 = vst [vmem:[#allocation3 + $0x138] sm:$0xff] %v469_v17  ;;  %617 = vst [vmem:[#allocation3 + $0x38] sm:$0xff] %v437_v18 }
  0xce   :  { %581 = vxpose.xlu1.b32.cont [4/16] %v1247_v24, 128  ;;  %v470_v19 = vpop.trf.xlu1  ;;  %549 = vxpose.xlu0.b32.cont [4/16] %v1252_v25, 128  ;;  %v438_v20 = vpop.trf.xlu0 }
  0xcf   :  { %651 = vst [vmem:[#allocation3 + $0x148] sm:$0xff] %v470_v19  ;;  %619 = vst [vmem:[#allocation3 + $0x48] sm:$0xff] %v438_v20 }
  0xd2   :  { %582 = vxpose.xlu1.b32.cont [5/16] %v1259_v26, 128  ;;  %v471_v21 = vpop.trf.xlu1  ;;  %550 = vxpose.xlu0.b32.cont [5/16] %v1264_v27, 128  ;;  %v439_v22 = vpop.trf.xlu0 }
  0xd3   :  { %653 = vst [vmem:[#allocation3 + $0x158] sm:$0xff] %v471_v21  ;;  %621 = vst [vmem:[#allocation3 + $0x58] sm:$0xff] %v439_v22 }
  0xd6   :  { %583 = vxpose.xlu1.b32.cont [6/16] %v1271_v28, 128  ;;  %v472_v23 = vpop.trf.xlu1  ;;  %551 = vxpose.xlu0.b32.cont [6/16] %v1276_v29, 128  ;;  %v440_v24 = vpop.trf.xlu0 }
  0xd7   :  { %655 = vst [vmem:[#allocation3 + $0x168] sm:$0xff] %v472_v23  ;;  %623 = vst [vmem:[#allocation3 + $0x68] sm:$0xff] %v440_v24 }
  0xda   :  { %584 = vxpose.xlu1.b32.cont [7/16] %v1283_v30, 128  ;;  %v473_v25 = vpop.trf.xlu1  ;;  %552 = vxpose.xlu0.b32.cont [7/16] %v1288_v31, 128  ;;  %v441_v26 = vpop.trf.xlu0  ;;  %v341_v31 = vld [vmem:[#allocation2 + $0xc8] sm:$0xff] }
  0xdb   :  { %657 = vst [vmem:[#allocation3 + $0x178] sm:$0xff] %v473_v25  ;;  %625 = vst [vmem:[#allocation3 + $0x78] sm:$0xff] %v441_v26 }
  0xde   :  { %585 = vxpose.xlu1.b32.cont [8/16] %v1295_v32, 128  ;;  %v474_v27 = vpop.trf.xlu1  ;;  %553 = vxpose.xlu0.b32.cont [8/16] %v1300_v33, 128  ;;  %v442_v28 = vpop.trf.xlu0  ;;  %v343_v33 = vld [vmem:[#allocation2 + $0x1d0] sm:$0xff] }
  0xdf   :  { %659 = vst [vmem:[#allocation3 + $0x188] sm:$0xff] %v474_v27  ;;  %627 = vst [vmem:[#allocation3 + $0x88] sm:$0xff] %v442_v28 }
  0xe2   :  { %586 = vxpose.xlu1.b32.cont [9/16] %v1307_v34, 128  ;;  %v475_v29 = vpop.trf.xlu1  ;;  %554 = vxpose.xlu0.b32.cont [9/16] %v1312_v35, 128  ;;  %v443_v30 = vpop.trf.xlu0  ;;  %v345_v35 = vld [vmem:[#allocation2 + $0x1b8] sm:$0xff] }
  0xe3   :  { %661 = vst [vmem:[#allocation3 + $0x198] sm:$0xff] %v475_v29  ;;  %629 = vst [vmem:[#allocation3 + $0x98] sm:$0xff] %v443_v30 }
  0xe6   :  { %587 = vxpose.xlu1.b32.cont [10/16] %v341_v31, 128  ;;  %v476_v44 = vpop.trf.xlu1  ;;  %555 = vxpose.xlu0.b32.cont [10/16] %v340_v43, 128  ;;  %v444_v32 = vpop.trf.xlu0 }
  0xe7   :  { %663 = vst [vmem:[#allocation3 + $0x1a8] sm:$0xff] %v476_v44  ;;  %631 = vst [vmem:[#allocation3 + $0xa8] sm:$0xff] %v444_v32 }
  0xea   :  { %588 = vxpose.xlu1.b32.cont [11/16] %v343_v33, 128  ;;  %v477_v46 = vpop.trf.xlu1  ;;  %556 = vxpose.xlu0.b32.cont [11/16] %v342_v45, 128  ;;  %v445_v34 = vpop.trf.xlu0 }
  0xeb   :  { %665 = vst [vmem:[#allocation3 + $0x1b8] sm:$0xff] %v477_v46  ;;  %633 = vst [vmem:[#allocation3 + $0xb8] sm:$0xff] %v445_v34 }
  0xee   :  { %589 = vxpose.xlu1.b32.cont [12/16] %v345_v35, 128  ;;  %v478_v48 = vpop.trf.xlu1  ;;  %557 = vxpose.xlu0.b32.cont [12/16] %v344_v47, 128  ;;  %v446_v49 = vpop.trf.xlu0 }
  0xef   :  { %667 = vst [vmem:[#allocation3 + $0x1c8] sm:$0xff] %v478_v48  ;;  %635 = vst [vmem:[#allocation3 + $0xc8] sm:$0xff] %v446_v49 }
  0xf2   :  { %590 = vxpose.xlu1.b32.cont [13/16] %v347_v36, 128  ;;  %v479_v38 = vpop.trf.xlu1  ;;  %558 = vxpose.xlu0.b32.cont [13/16] %v346_v37, 128  ;;  %v447_v39 = vpop.trf.xlu0 }
  0xf3   :  { %669 = vst [vmem:[#allocation3 + $0x1d8] sm:$0xff] %v479_v38  ;;  %637 = vst [vmem:[#allocation3 + $0xd8] sm:$0xff] %v447_v39 }
  0xf6   :  { %591 = vxpose.xlu1.b32.cont [14/16] %v349_v40, 128  ;;  %v480_v42 = vpop.trf.xlu1  ;;  %559 = vxpose.xlu0.b32.cont [14/16] %v348_v41, 128  ;;  %v448_v50 = vpop.trf.xlu0 }
  0xf7   :  { %671 = vst [vmem:[#allocation3 + $0x1e8] sm:$0xff] %v480_v42  ;;  %639 = vst [vmem:[#allocation3 + $0xe8] sm:$0xff] %v448_v50 }
  0xfa   :  { %592 = vxpose.xlu1.b32.cont [15/16] %v351_v51, 128  ;;  %v481_v53 = vpop.trf.xlu1  ;;  %560 = vxpose.xlu0.b32.cont [15/16] %v350_v52, 128  ;;  %v449_v54 = vpop.trf.xlu0 }
  0xfb   :  { %673 = vst [vmem:[#allocation3 + $0x1f8] sm:$0xff] %v481_v53  ;;  %641 = vst [vmem:[#allocation3 + $0xf8] sm:$0xff] %v449_v54 }
  0xfe   :  { %593 = vxpose.xlu1.b32.end [16/16] %v353_v55, 128  ;;  %v530_v57 = vpop.trf.xlu1  ;;  %561 = vxpose.xlu0.b32.end [16/16] %v352_v56, 128  ;;  %v498_v58 = vpop.trf.xlu0 }
  0xff   :  { %706 = vst [vmem:[#allocation3 + $0x300] sm:$0xff] %v530_v57  ;;  %674 = vst [vmem:[#allocation3 + $0x200] sm:$0xff] %v498_v58 }
 0x102   :  { %v531_v59 = vpop.trf.xlu1  ;;  %v499_v60 = vpop.trf.xlu0 }
 0x103   :  { %708 = vst [vmem:[#allocation3 + $0x310] sm:$0xff] %v531_v59  ;;  %676 = vst [vmem:[#allocation3 + $0x210] sm:$0xff] %v499_v60 }
 0x106   :  { %v532_v61 = vpop.trf.xlu1  ;;  %v500_v62 = vpop.trf.xlu0 }
 0x107   :  { %710 = vst [vmem:[#allocation3 + $0x320] sm:$0xff] %v532_v61  ;;  %678 = vst [vmem:[#allocation3 + $0x220] sm:$0xff] %v500_v62 }
 0x10a   :  { %v533_v63 = vpop.trf.xlu1  ;;  %v501_v0 = vpop.trf.xlu0 }
 0x10b   :  { %712 = vst [vmem:[#allocation3 + $0x330] sm:$0xff] %v533_v63  ;;  %680 = vst [vmem:[#allocation3 + $0x230] sm:$0xff] %v501_v0 }
 0x10e   :  { %v534_v1 = vpop.trf.xlu1  ;;  %v502_v2 = vpop.trf.xlu0 }
 0x10f   :  { %714 = vst [vmem:[#allocation3 + $0x340] sm:$0xff] %v534_v1  ;;  %682 = vst [vmem:[#allocation3 + $0x240] sm:$0xff] %v502_v2 }
 0x112   :  { %v535_v3 = vpop.trf.xlu1  ;;  %v503_v4 = vpop.trf.xlu0 }
 0x113   :  { %716 = vst [vmem:[#allocation3 + $0x350] sm:$0xff] %v535_v3  ;;  %684 = vst [vmem:[#allocation3 + $0x250] sm:$0xff] %v503_v4 }
 0x116   :  { %v536_v5 = vpop.trf.xlu1  ;;  %v504_v6 = vpop.trf.xlu0 }
 0x117   :  { %718 = vst [vmem:[#allocation3 + $0x360] sm:$0xff] %v536_v5  ;;  %686 = vst [vmem:[#allocation3 + $0x260] sm:$0xff] %v504_v6 }
 0x11a   :  { %v537_v7 = vpop.trf.xlu1  ;;  %v505_v8 = vpop.trf.xlu0 }
 0x11b   :  { %720 = vst [vmem:[#allocation3 + $0x370] sm:$0xff] %v537_v7  ;;  %688 = vst [vmem:[#allocation3 + $0x270] sm:$0xff] %v505_v8 }
 0x11e   :  { %v538_v9 = vpop.trf.xlu1  ;;  %v506_v10 = vpop.trf.xlu0 }
 0x11f   :  { %722 = vst [vmem:[#allocation3 + $0x380] sm:$0xff] %v538_v9  ;;  %690 = vst [vmem:[#allocation3 + $0x280] sm:$0xff] %v506_v10 }
 0x122   :  { %v539_v11 = vpop.trf.xlu1  ;;  %v507_v12 = vpop.trf.xlu0 }
 0x123   :  { %724 = vst [vmem:[#allocation3 + $0x390] sm:$0xff] %v539_v11  ;;  %692 = vst [vmem:[#allocation3 + $0x290] sm:$0xff] %v507_v12 }
 0x126   :  { %v540_v13 = vpop.trf.xlu1  ;;  %v508_v14 = vpop.trf.xlu0 }
 0x127   :  { %726 = vst [vmem:[#allocation3 + $0x3a0] sm:$0xff] %v540_v13  ;;  %694 = vst [vmem:[#allocation3 + $0x2a0] sm:$0xff] %v508_v14 }
 0x12a   :  { %v541_v15 = vpop.trf.xlu1  ;;  %v509_v16 = vpop.trf.xlu0 }
 0x12b   :  { %728 = vst [vmem:[#allocation3 + $0x3b0] sm:$0xff] %v541_v15  ;;  %696 = vst [vmem:[#allocation3 + $0x2b0] sm:$0xff] %v509_v16 }
 0x12e   :  { %v542_v17 = vpop.trf.xlu1  ;;  %v510_v18 = vpop.trf.xlu0 }
 0x12f   :  { %730 = vst [vmem:[#allocation3 + $0x3c0] sm:$0xff] %v542_v17  ;;  %698 = vst [vmem:[#allocation3 + $0x2c0] sm:$0xff] %v510_v18 }
 0x132   :  { %v543_v19 = vpop.trf.xlu1  ;;  %v511_v20 = vpop.trf.xlu0 }
 0x133   :  { %732 = vst [vmem:[#allocation3 + $0x3d0] sm:$0xff] %v543_v19  ;;  %700 = vst [vmem:[#allocation3 + $0x2d0] sm:$0xff] %v511_v20 }
 0x136   :  { %v544_v21 = vpop.trf.xlu1  ;;  %v512_v22 = vpop.trf.xlu0 }
 0x137   :  { %734 = vst [vmem:[#allocation3 + $0x3e0] sm:$0xff] %v544_v21  ;;  %702 = vst [vmem:[#allocation3 + $0x2e0] sm:$0xff] %v512_v22 }
 0x13a   :  { %v545_v23 = vpop.trf.xlu1  ;;  %v513_v24 = vpop.trf.xlu0 }
 0x13b   :  { %736 = vst [vmem:[#allocation3 + $0x3f0] sm:$0xff] %v545_v23  ;;  %704 = vst [vmem:[#allocation3 + $0x2f0] sm:$0xff] %v513_v24 }
 0x13e   :  { %v594_v25 = vpop.trf.xlu1  ;;  %v562_v26 = vpop.trf.xlu0 }
 0x13f   :  { %707 = vst [vmem:[#allocation3 + $0x308] sm:$0xff] %v594_v25  ;;  %675 = vst [vmem:[#allocation3 + $0x208] sm:$0xff] %v562_v26 }
 0x142   :  { %v595_v27 = vpop.trf.xlu1  ;;  %v563_v28 = vpop.trf.xlu0 }
 0x143   :  { %709 = vst [vmem:[#allocation3 + $0x318] sm:$0xff] %v595_v27  ;;  %677 = vst [vmem:[#allocation3 + $0x218] sm:$0xff] %v563_v28 }
 0x146   :  { %v596_v29 = vpop.trf.xlu1  ;;  %v564_v30 = vpop.trf.xlu0 }
 0x147   :  { %711 = vst [vmem:[#allocation3 + $0x328] sm:$0xff] %v596_v29  ;;  %679 = vst [vmem:[#allocation3 + $0x228] sm:$0xff] %v564_v30 }
 0x14a   :  { %v597_v31 = vpop.trf.xlu1  ;;  %v565_v43 = vpop.trf.xlu0 }
 0x14b   :  { %713 = vst [vmem:[#allocation3 + $0x338] sm:$0xff] %v597_v31  ;;  %681 = vst [vmem:[#allocation3 + $0x238] sm:$0xff] %v565_v43 }
 0x14e   :  { %v598_v44 = vpop.trf.xlu1  ;;  %v566_v32 = vpop.trf.xlu0 }
 0x14f   :  { %715 = vst [vmem:[#allocation3 + $0x348] sm:$0xff] %v598_v44  ;;  %683 = vst [vmem:[#allocation3 + $0x248] sm:$0xff] %v566_v32 }
 0x152   :  { %v599_v33 = vpop.trf.xlu1  ;;  %v567_v45 = vpop.trf.xlu0 }
 0x153   :  { %717 = vst [vmem:[#allocation3 + $0x358] sm:$0xff] %v599_v33  ;;  %685 = vst [vmem:[#allocation3 + $0x258] sm:$0xff] %v567_v45 }
 0x156   :  { %v600_v46 = vpop.trf.xlu1  ;;  %v568_v34 = vpop.trf.xlu0 }
 0x157   :  { %719 = vst [vmem:[#allocation3 + $0x368] sm:$0xff] %v600_v46  ;;  %687 = vst [vmem:[#allocation3 + $0x268] sm:$0xff] %v568_v34 }
 0x15a   :  { %v601_v35 = vpop.trf.xlu1  ;;  %v569_v47 = vpop.trf.xlu0 }
 0x15b   :  { %721 = vst [vmem:[#allocation3 + $0x378] sm:$0xff] %v601_v35  ;;  %689 = vst [vmem:[#allocation3 + $0x278] sm:$0xff] %v569_v47 }
 0x15e   :  { %v602_v48 = vpop.trf.xlu1  ;;  %v570_v49 = vpop.trf.xlu0 }
 0x15f   :  { %723 = vst [vmem:[#allocation3 + $0x388] sm:$0xff] %v602_v48  ;;  %691 = vst [vmem:[#allocation3 + $0x288] sm:$0xff] %v570_v49 }
 0x162   :  { %v603_v36 = vpop.trf.xlu1  ;;  %v571_v37 = vpop.trf.xlu0 }
 0x163   :  { %725 = vst [vmem:[#allocation3 + $0x398] sm:$0xff] %v603_v36  ;;  %693 = vst [vmem:[#allocation3 + $0x298] sm:$0xff] %v571_v37 }
 0x166   :  { %v604_v38 = vpop.trf.xlu1  ;;  %v572_v39 = vpop.trf.xlu0 }
 0x167   :  { %727 = vst [vmem:[#allocation3 + $0x3a8] sm:$0xff] %v604_v38  ;;  %695 = vst [vmem:[#allocation3 + $0x2a8] sm:$0xff] %v572_v39 }
 0x16a   :  { %v605_v40 = vpop.trf.xlu1  ;;  %v573_v41 = vpop.trf.xlu0 }
 0x16b   :  { %729 = vst [vmem:[#allocation3 + $0x3b8] sm:$0xff] %v605_v40  ;;  %697 = vst [vmem:[#allocation3 + $0x2b8] sm:$0xff] %v573_v41 }
 0x16e   :  { %v606_v42 = vpop.trf.xlu1  ;;  %v574_v50 = vpop.trf.xlu0 }
 0x16f   :  { %731 = vst [vmem:[#allocation3 + $0x3c8] sm:$0xff] %v606_v42  ;;  %699 = vst [vmem:[#allocation3 + $0x2c8] sm:$0xff] %v574_v50 }
 0x172   :  { %v607_v51 = vpop.trf.xlu1  ;;  %v575_v52 = vpop.trf.xlu0 }
 0x173   :  { %733 = vst [vmem:[#allocation3 + $0x3d8] sm:$0xff] %v607_v51  ;;  %701 = vst [vmem:[#allocation3 + $0x2d8] sm:$0xff] %v575_v52 }
 0x176   :  { %v608_v53 = vpop.trf.xlu1  ;;  %v576_v54 = vpop.trf.xlu0 }
 0x177   :  { %735 = vst [vmem:[#allocation3 + $0x3e8] sm:$0xff] %v608_v53  ;;  %703 = vst [vmem:[#allocation3 + $0x2e8] sm:$0xff] %v576_v54 }
 0x17a   :  { %v609_v55 = vpop.trf.xlu1  ;;  %v577_v56 = vpop.trf.xlu0 }
 0x17b   :  { %737 = vst [vmem:[#allocation3 + $0x3f8] sm:$0xff] %v609_v55  ;;  %705 = vst [vmem:[#allocation3 + $0x2f8] sm:$0xff] %v577_v56 }
 0x17c   :  { %742 = vsyncadd [#allocation4], 4096  ;;  %s792_s0 = smov [#allocation3]   ;;  %s793_s4 = smov 8192  }
 0x17d   :  { %s753_s3 = sshll.u32 %s792_s0, 4  ;;  %760 = sst [smem:[#allocation6]] %s793_s4  ;;  %s754_s3 = int_to_ptr.vmem [resolvable:$true] %s753_s3 }
 0x17e   :  { %s794_s5 = smov 6144   ;;  %s795_s6 = smov 24  }
 0x17f   :  { %762 = sst [smem:[#allocation6 + $0x1]] %s794_s5  ;;  %s796_s7 = smov 256  }
 0x180   :  { %764 = sst [smem:[#allocation6 + $0x2]] %s795_s6  ;;  %s797_s8 = smov 16  }
 0x181   :  { %766 = sst [smem:[#allocation6 + $0x3]] %s796_s7  ;;  %s798_s9 = smov [#allocation4]  }
 0x182   :  { %768 = sst [smem:[#allocation6 + $0x4]] %s796_s7  ;;  %s799_s10 = smov 131072  }
 0x183   :  { %770 = sst [smem:[#allocation6 + $0x5]] %s797_s8  ;;  %s800_s11 = smov 0  }
 0x184   :  { %772 = dma.general %s754_s3, 12288, %s1370_s1, %s798_s9, %s799_s10, [#allocation6], %s800_s11, 0  }
 0x185   :  { %790 = dma.done.wait [#allocation4], 16384  }
 0x186   :  { %791 = vsyncadd [#allocation4], 4294950912 }
 0x187   :  { %776 = vsyncpa [#allocation4], 1 }

</bundles_post_ra>
